<compile_context>
chip_gen: v6e
topology: v6e:2x2x1
jax: 0.10.0
libtpu: 0.0.40
codegen_flags: <defaults>
</compile_context>

<pallas_src>
import jax
import jax.numpy as jnp
from jax.experimental import pallas as pl
from jax.experimental.pallas import tpu as pltpu

INPUT_SIZE = 1
HIDDEN = 32

# Explicit matmul precision choice for the recurrent 32x32 dot (see header comment).
MATMUL_PRECISION = jax.lax.Precision.DEFAULT


def rnn_kernel(packed_ref, whh_t_ref, out_ref):
    """Elman RNN + output projection, fully unrolled over T.

    packed_ref : (4 + 2B, max(H, T))  row 0: W_ih^T, row 1: b_ih+b_hh, row 2: W_out,
                                      row 3: [b_out, 0...], rows 4..4+B: h0,
                                      rows 4+B..4+2B: x as (B, T)
    whh_t_ref  : (H, H)               W_hh^T
    out_ref    : (B, T + H)           [:, :T] = projected outputs, [:, T:] = final hidden state
    """
    B = out_ref.shape[0]
    H = whh_t_ref.shape[0]
    T = out_ref.shape[1] - H

    packed = packed_ref[...]                      # single load of the packed block
    wih = packed[0:1, :H]                         # (1, H)
    b = packed[1:2, :H]                           # (1, H)  fused b_ih + b_hh
    wout = packed[2:3, :H]                        # (1, H)
    bout = packed[3:4, 0:1]                       # (1, 1)
    h = packed[4:4 + B, :H]                       # (B, H)  initial hidden state
    x_bt = packed[4 + B:4 + 2 * B, :T]            # (B, T)  lane-dense input

    whh_t = whh_t_ref[...]                        # (H, H)

    # Hoisted input projection (I == 1): pure VPU broadcasts, no K=1 MXU ops, and entirely
    # independent of h, so it stays off the serial recurrent critical path.
    xw = [x_bt[:, t:t + 1] * wih + b for t in range(T)]      # T x (B, H)

    cols = []
    for t in range(T):                            # static unroll (T is small & fixed)
        pre = xw[t] + jnp.dot(h, whh_t,
                              preferred_element_type=jnp.float32,
                              precision=MATMUL_PRECISION)
        h = jnp.tanh(pre)                         # (B, H)  EUP, f32
        # Linear(H, 1) as VPU multiply + lane reduction; off the recurrent critical path.
        cols.append(jnp.sum(h * wout, axis=-1, keepdims=True))   # (B, 1)

    proj = jnp.concatenate(cols, axis=-1) + bout                 # (B, T)
    out_ref[...] = jnp.concatenate([proj, h], axis=-1)           # (B, T + H), one store


def rnn_forward(x, h_state, w_ih, w_hh, b_ih, b_hh, w_out, b_out):
    """Matches RNN.forward(x, h_state) of the PyTorch module.

    x       : (B, T, I)  batch-first, like PyTorch (I == 1)
    h_state : (1, B, H) or None
    returns (out, h_state) with out = Linear(r_out).squeeze(), h_state (1, B, H)
    """
    B, T, I = x.shape
    H = w_ih.shape[0]
    assert I == 1, "kernel is specialised for INPUT_SIZE == 1"
    if h_state is None:
        h_state = jnp.zeros((1, B, H), jnp.float32)

    W = max(H, T)

    def row(a):
        a = jnp.asarray(a, jnp.float32)
        return jnp.pad(a, ((0, 0), (0, W - a.shape[-1])))

    # One packed block: all small operands share a single HBM->VMEM DMA / padded VMEM tile.
    packed = jnp.concatenate([
        row(jnp.asarray(w_ih, jnp.float32).T.reshape(1, H)),   # row 0: W_ih^T
        row((b_ih + b_hh).reshape(1, H)),                      # row 1: fused bias
        row(jnp.asarray(w_out, jnp.float32).reshape(1, H)),    # row 2: W_out
        row(jnp.asarray(b_out, jnp.float32).reshape(1, 1)),    # row 3: b_out
        row(h_state[0]),                                       # rows 4 .. 4+B : h0
        row(x[:, :, 0]),                                       # rows 4+B..4+2B: x (B, T)
    ], axis=0)                                                 # (4 + 2B, W)

    whh_t = jnp.asarray(w_hh, jnp.float32).T                   # (H, H)

    out_packed = pl.pallas_call(
        rnn_kernel,
        out_shape=jax.ShapeDtypeStruct((B, T + H), jnp.float32),
        in_specs=[pl.BlockSpec(memory_space=pltpu.MemorySpace.VMEM)] * 2,
        out_specs=pl.BlockSpec(memory_space=pltpu.MemorySpace.VMEM),
    )(packed, whh_t)

    out = jnp.squeeze(out_packed[:, :T])     # (B, T); .squeeze() mirrors PyTorch semantics
    h_fin = out_packed[:, T:]                # (B, H)
    return out, h_fin[None]                  # h_state: (1, B, H)


def ref_forward(x, h_state, w_ih, w_hh, b_ih, b_hh, w_out, b_out):
    """Pure-JAX reference mirroring PyTorch nn.RNN + Linear semantics (same default precision)."""
    B, T, I = x.shape
    h = h_state[0] if h_state is not None else jnp.zeros((B, HIDDEN), jnp.float32)
    hs = []
    for t in range(T):
        h = jnp.tanh(x[:, t, :] @ w_ih.T + b_ih + h @ w_hh.T + b_hh)
        hs.append(h)
    r_out = jnp.stack(hs, axis=1)              # (B, T, H)
    out = r_out @ w_out.T + b_out              # (B, T, 1)
    return jnp.squeeze(out), h[None]


if __name__ == "__main__":
    B, T, I, H = 2, 8, INPUT_SIZE, HIDDEN

    key = jax.random.PRNGKey(0)
    kx, k1, k2, k3, k4, k5, k6 = jax.random.split(key, 7)

    # Deterministic parameter init, PyTorch-style U(-1/sqrt(H), 1/sqrt(H)).
    bound = 1.0 / jnp.sqrt(jnp.float32(H))
    w_ih = jax.random.uniform(k1, (H, I), jnp.float32, -bound, bound)
    w_hh = jax.random.uniform(k2, (H, H), jnp.float32, -bound, bound)
    b_ih = jax.random.uniform(k3, (H,), jnp.float32, -bound, bound)
    b_hh = jax.random.uniform(k4, (H,), jnp.float32, -bound, bound)
    w_out = jax.random.uniform(k5, (1, H), jnp.float32, -bound, bound)
    b_out = jax.random.uniform(k6, (1,), jnp.float32, -bound, bound)

    x = jax.random.normal(kx, (B, T, I), jnp.float32)
    h_state = None   # same as the PyTorch script's initial h_state

    out, h_new = rnn_forward(x, h_state, w_ih, w_hh, b_ih, b_hh, w_out, b_out)
    out = jax.block_until_ready(out)
    h_new = jax.block_until_ready(h_new)

    out_ref, h_ref = ref_forward(x, h_state, w_ih, w_hh, b_ih, b_hh, w_out, b_out)
    assert out.shape == (B, T) and h_new.shape == (1, B, H)
    assert jnp.allclose(out, out_ref, atol=1e-5, rtol=1e-5)
    assert jnp.allclose(h_new, h_ref, atol=1e-5, rtol=1e-5)

    print("KERNEL_OK")
</pallas_src>

<mosaic_0001>
module attributes {stable_mosaic.version = 11 : i64} {
  func.func @rnn_kernel(%arg0: memref<8x32xf32, #tpu.memory_space<vmem>>, %arg1: memref<32x32xf32, #tpu.memory_space<vmem>>, %arg2: memref<2x40xf32, #tpu.memory_space<vmem>>) attributes {dimension_semantics = [], scalar_prefetch = 0 : i64, scratch_operands = 0 : i64, tpu.core_type = #tpu.core_type<tc>} {
    %c0 = arith.constant 0 : index
    %c0_0 = arith.constant 0 : index
    %0 = vector.load %arg0[%c0, %c0_0] : memref<8x32xf32, #tpu.memory_space<vmem>>, vector<8x32xf32>
    %1 = vector.extract_strided_slice %0 {offsets = [0, 0], sizes = [1, 32], strides = [1, 1]} : vector<8x32xf32> to vector<1x32xf32>
    %2 = vector.extract_strided_slice %0 {offsets = [1, 0], sizes = [1, 32], strides = [1, 1]} : vector<8x32xf32> to vector<1x32xf32>
    %3 = vector.extract_strided_slice %0 {offsets = [2, 0], sizes = [1, 32], strides = [1, 1]} : vector<8x32xf32> to vector<1x32xf32>
    %4 = vector.extract_strided_slice %0 {offsets = [3, 0], sizes = [1, 1], strides = [1, 1]} : vector<8x32xf32> to vector<1x1xf32>
    %5 = vector.extract_strided_slice %0 {offsets = [4, 0], sizes = [2, 32], strides = [1, 1]} : vector<8x32xf32> to vector<2x32xf32>
    %6 = vector.extract_strided_slice %0 {offsets = [6, 0], sizes = [2, 8], strides = [1, 1]} : vector<8x32xf32> to vector<2x8xf32>
    %c0_1 = arith.constant 0 : index
    %c0_2 = arith.constant 0 : index
    %7 = vector.load %arg1[%c0_1, %c0_2] : memref<32x32xf32, #tpu.memory_space<vmem>>, vector<32x32xf32>
    %8 = vector.extract_strided_slice %6 {offsets = [0, 0], sizes = [2, 1], strides = [1, 1]} : vector<2x8xf32> to vector<2x1xf32>
    %9 = vector.broadcast %8 : vector<2x1xf32> to vector<2x32xf32>
    %10 = vector.broadcast %1 : vector<1x32xf32> to vector<2x32xf32>
    %11 = arith.mulf %9, %10 : vector<2x32xf32>
    %12 = vector.broadcast %2 : vector<1x32xf32> to vector<2x32xf32>
    %13 = arith.addf %11, %12 : vector<2x32xf32>
    %14 = vector.extract_strided_slice %6 {offsets = [0, 1], sizes = [2, 1], strides = [1, 1]} : vector<2x8xf32> to vector<2x1xf32>
    %15 = vector.broadcast %14 : vector<2x1xf32> to vector<2x32xf32>
    %16 = vector.broadcast %1 : vector<1x32xf32> to vector<2x32xf32>
    %17 = arith.mulf %15, %16 : vector<2x32xf32>
    %18 = vector.broadcast %2 : vector<1x32xf32> to vector<2x32xf32>
    %19 = arith.addf %17, %18 : vector<2x32xf32>
    %20 = vector.extract_strided_slice %6 {offsets = [0, 2], sizes = [2, 1], strides = [1, 1]} : vector<2x8xf32> to vector<2x1xf32>
    %21 = vector.broadcast %20 : vector<2x1xf32> to vector<2x32xf32>
    %22 = vector.broadcast %1 : vector<1x32xf32> to vector<2x32xf32>
    %23 = arith.mulf %21, %22 : vector<2x32xf32>
    %24 = vector.broadcast %2 : vector<1x32xf32> to vector<2x32xf32>
    %25 = arith.addf %23, %24 : vector<2x32xf32>
    %26 = vector.extract_strided_slice %6 {offsets = [0, 3], sizes = [2, 1], strides = [1, 1]} : vector<2x8xf32> to vector<2x1xf32>
    %27 = vector.broadcast %26 : vector<2x1xf32> to vector<2x32xf32>
    %28 = vector.broadcast %1 : vector<1x32xf32> to vector<2x32xf32>
    %29 = arith.mulf %27, %28 : vector<2x32xf32>
    %30 = vector.broadcast %2 : vector<1x32xf32> to vector<2x32xf32>
    %31 = arith.addf %29, %30 : vector<2x32xf32>
    %32 = vector.extract_strided_slice %6 {offsets = [0, 4], sizes = [2, 1], strides = [1, 1]} : vector<2x8xf32> to vector<2x1xf32>
    %33 = vector.broadcast %32 : vector<2x1xf32> to vector<2x32xf32>
    %34 = vector.broadcast %1 : vector<1x32xf32> to vector<2x32xf32>
    %35 = arith.mulf %33, %34 : vector<2x32xf32>
    %36 = vector.broadcast %2 : vector<1x32xf32> to vector<2x32xf32>
    %37 = arith.addf %35, %36 : vector<2x32xf32>
    %38 = vector.extract_strided_slice %6 {offsets = [0, 5], sizes = [2, 1], strides = [1, 1]} : vector<2x8xf32> to vector<2x1xf32>
    %39 = vector.broadcast %38 : vector<2x1xf32> to vector<2x32xf32>
    %40 = vector.broadcast %1 : vector<1x32xf32> to vector<2x32xf32>
    %41 = arith.mulf %39, %40 : vector<2x32xf32>
    %42 = vector.broadcast %2 : vector<1x32xf32> to vector<2x32xf32>
    %43 = arith.addf %41, %42 : vector<2x32xf32>
    %44 = vector.extract_strided_slice %6 {offsets = [0, 6], sizes = [2, 1], strides = [1, 1]} : vector<2x8xf32> to vector<2x1xf32>
    %45 = vector.broadcast %44 : vector<2x1xf32> to vector<2x32xf32>
    %46 = vector.broadcast %1 : vector<1x32xf32> to vector<2x32xf32>
    %47 = arith.mulf %45, %46 : vector<2x32xf32>
    %48 = vector.broadcast %2 : vector<1x32xf32> to vector<2x32xf32>
    %49 = arith.addf %47, %48 : vector<2x32xf32>
    %50 = vector.extract_strided_slice %6 {offsets = [0, 7], sizes = [2, 1], strides = [1, 1]} : vector<2x8xf32> to vector<2x1xf32>
    %51 = vector.broadcast %50 : vector<2x1xf32> to vector<2x32xf32>
    %52 = vector.broadcast %1 : vector<1x32xf32> to vector<2x32xf32>
    %53 = arith.mulf %51, %52 : vector<2x32xf32>
    %54 = vector.broadcast %2 : vector<1x32xf32> to vector<2x32xf32>
    %55 = arith.addf %53, %54 : vector<2x32xf32>
    %cst = arith.constant dense<0.000000e+00> : vector<2x32xf32>
    %56 = tpu.matmul %5, %7, %cst {dimension_numbers = #tpu.dot_dimension_numbers<[1], [0], [0], [1], [0, 0, 1, 1], [], []>} : vector<2x32xf32>, vector<32x32xf32>, vector<2x32xf32> -> vector<2x32xf32>
    %57 = arith.addf %13, %56 : vector<2x32xf32>
    %58 = math.tanh %57 : vector<2x32xf32>
    %59 = vector.broadcast %3 : vector<1x32xf32> to vector<2x32xf32>
    %60 = arith.mulf %58, %59 : vector<2x32xf32>
    %cst_3 = arith.constant dense<0.000000e+00> : vector<2xf32>
    %61 = vector.multi_reduction <add>, %60, %cst_3 [1] : vector<2x32xf32> to vector<2xf32>
    %62 = vector.shape_cast %61 : vector<2xf32> to vector<2x1xf32>
    %cst_4 = arith.constant dense<0.000000e+00> : vector<2x32xf32>
    %63 = tpu.matmul %58, %7, %cst_4 {dimension_numbers = #tpu.dot_dimension_numbers<[1], [0], [0], [1], [0, 0, 1, 1], [], []>} : vector<2x32xf32>, vector<32x32xf32>, vector<2x32xf32> -> vector<2x32xf32>
    %64 = arith.addf %19, %63 : vector<2x32xf32>
    %65 = math.tanh %64 : vector<2x32xf32>
    %66 = vector.broadcast %3 : vector<1x32xf32> to vector<2x32xf32>
    %67 = arith.mulf %65, %66 : vector<2x32xf32>
    %cst_5 = arith.constant dense<0.000000e+00> : vector<2xf32>
    %68 = vector.multi_reduction <add>, %67, %cst_5 [1] : vector<2x32xf32> to vector<2xf32>
    %69 = vector.shape_cast %68 : vector<2xf32> to vector<2x1xf32>
    %cst_6 = arith.constant dense<0.000000e+00> : vector<2x32xf32>
    %70 = tpu.matmul %65, %7, %cst_6 {dimension_numbers = #tpu.dot_dimension_numbers<[1], [0], [0], [1], [0, 0, 1, 1], [], []>} : vector<2x32xf32>, vector<32x32xf32>, vector<2x32xf32> -> vector<2x32xf32>
    %71 = arith.addf %25, %70 : vector<2x32xf32>
    %72 = math.tanh %71 : vector<2x32xf32>
    %73 = vector.broadcast %3 : vector<1x32xf32> to vector<2x32xf32>
    %74 = arith.mulf %72, %73 : vector<2x32xf32>
    %cst_7 = arith.constant dense<0.000000e+00> : vector<2xf32>
    %75 = vector.multi_reduction <add>, %74, %cst_7 [1] : vector<2x32xf32> to vector<2xf32>
    %76 = vector.shape_cast %75 : vector<2xf32> to vector<2x1xf32>
    %cst_8 = arith.constant dense<0.000000e+00> : vector<2x32xf32>
    %77 = tpu.matmul %72, %7, %cst_8 {dimension_numbers = #tpu.dot_dimension_numbers<[1], [0], [0], [1], [0, 0, 1, 1], [], []>} : vector<2x32xf32>, vector<32x32xf32>, vector<2x32xf32> -> vector<2x32xf32>
    %78 = arith.addf %31, %77 : vector<2x32xf32>
    %79 = math.tanh %78 : vector<2x32xf32>
    %80 = vector.broadcast %3 : vector<1x32xf32> to vector<2x32xf32>
    %81 = arith.mulf %79, %80 : vector<2x32xf32>
    %cst_9 = arith.constant dense<0.000000e+00> : vector<2xf32>
    %82 = vector.multi_reduction <add>, %81, %cst_9 [1] : vector<2x32xf32> to vector<2xf32>
    %83 = vector.shape_cast %82 : vector<2xf32> to vector<2x1xf32>
    %cst_10 = arith.constant dense<0.000000e+00> : vector<2x32xf32>
    %84 = tpu.matmul %79, %7, %cst_10 {dimension_numbers = #tpu.dot_dimension_numbers<[1], [0], [0], [1], [0, 0, 1, 1], [], []>} : vector<2x32xf32>, vector<32x32xf32>, vector<2x32xf32> -> vector<2x32xf32>
    %85 = arith.addf %37, %84 : vector<2x32xf32>
    %86 = math.tanh %85 : vector<2x32xf32>
    %87 = vector.broadcast %3 : vector<1x32xf32> to vector<2x32xf32>
    %88 = arith.mulf %86, %87 : vector<2x32xf32>
    %cst_11 = arith.constant dense<0.000000e+00> : vector<2xf32>
    %89 = vector.multi_reduction <add>, %88, %cst_11 [1] : vector<2x32xf32> to vector<2xf32>
    %90 = vector.shape_cast %89 : vector<2xf32> to vector<2x1xf32>
    %cst_12 = arith.constant dense<0.000000e+00> : vector<2x32xf32>
    %91 = tpu.matmul %86, %7, %cst_12 {dimension_numbers = #tpu.dot_dimension_numbers<[1], [0], [0], [1], [0, 0, 1, 1], [], []>} : vector<2x32xf32>, vector<32x32xf32>, vector<2x32xf32> -> vector<2x32xf32>
    %92 = arith.addf %43, %91 : vector<2x32xf32>
    %93 = math.tanh %92 : vector<2x32xf32>
    %94 = vector.broadcast %3 : vector<1x32xf32> to vector<2x32xf32>
    %95 = arith.mulf %93, %94 : vector<2x32xf32>
    %cst_13 = arith.constant dense<0.000000e+00> : vector<2xf32>
    %96 = vector.multi_reduction <add>, %95, %cst_13 [1] : vector<2x32xf32> to vector<2xf32>
    %97 = vector.shape_cast %96 : vector<2xf32> to vector<2x1xf32>
    %cst_14 = arith.constant dense<0.000000e+00> : vector<2x32xf32>
    %98 = tpu.matmul %93, %7, %cst_14 {dimension_numbers = #tpu.dot_dimension_numbers<[1], [0], [0], [1], [0, 0, 1, 1], [], []>} : vector<2x32xf32>, vector<32x32xf32>, vector<2x32xf32> -> vector<2x32xf32>
    %99 = arith.addf %49, %98 : vector<2x32xf32>
    %100 = math.tanh %99 : vector<2x32xf32>
    %101 = vector.broadcast %3 : vector<1x32xf32> to vector<2x32xf32>
    %102 = arith.mulf %100, %101 : vector<2x32xf32>
    %cst_15 = arith.constant dense<0.000000e+00> : vector<2xf32>
    %103 = vector.multi_reduction <add>, %102, %cst_15 [1] : vector<2x32xf32> to vector<2xf32>
    %104 = vector.shape_cast %103 : vector<2xf32> to vector<2x1xf32>
    %cst_16 = arith.constant dense<0.000000e+00> : vector<2x32xf32>
    %105 = tpu.matmul %100, %7, %cst_16 {dimension_numbers = #tpu.dot_dimension_numbers<[1], [0], [0], [1], [0, 0, 1, 1], [], []>} : vector<2x32xf32>, vector<32x32xf32>, vector<2x32xf32> -> vector<2x32xf32>
    %106 = arith.addf %55, %105 : vector<2x32xf32>
    %107 = math.tanh %106 : vector<2x32xf32>
    %108 = vector.broadcast %3 : vector<1x32xf32> to vector<2x32xf32>
    %109 = arith.mulf %107, %108 : vector<2x32xf32>
    %cst_17 = arith.constant dense<0.000000e+00> : vector<2xf32>
    %110 = vector.multi_reduction <add>, %109, %cst_17 [1] : vector<2x32xf32> to vector<2xf32>
    %111 = vector.shape_cast %110 : vector<2xf32> to vector<2x1xf32>
    %112 = tpu.concatenate %62, %69, %76, %83, %90, %97, %104, %111 in 1 : vector<2x1xf32>, vector<2x1xf32>, vector<2x1xf32>, vector<2x1xf32>, vector<2x1xf32>, vector<2x1xf32>, vector<2x1xf32>, vector<2x1xf32> -> vector<2x8xf32>
    %113 = vector.broadcast %4 : vector<1x1xf32> to vector<2x8xf32>
    %114 = arith.addf %112, %113 : vector<2x8xf32>
    %115 = tpu.concatenate %114, %107 in 1 : vector<2x8xf32>, vector<2x32xf32> -> vector<2x40xf32>
    %c0_18 = arith.constant 0 : index
    %c0_19 = arith.constant 0 : index
    %116 = vector.load %arg2[%c0_18, %c0_19] : memref<2x40xf32, #tpu.memory_space<vmem>>, vector<2x40xf32>
    tpu.vector_store %arg2[%c0_18, %c0_19], %115 {strides = array<i32>} : memref<2x40xf32, #tpu.memory_space<vmem>>, vector<2x40xf32>,
    return
  }
}

</mosaic_0001>

<bundles_post_ra>
// kernel: tpu_custom_call.1
= control target key start
LH: loop header
LB: loop body
LE: loop exit
PB: predicated region body
PF: predicated region fallthrough
CT: control target
= control target key end

     0   :  { %7 = vsyncpa [#allocation3], 0  ;;  %s1246_s0 = inlined_call_operand.hbm [shape: f32[8,32], index: 0, kind: input, shape index: {}]   ;;  %s1247_s1 = inlined_call_operand.hbm [shape: f32[32,32], index: 1, kind: input, shape index: {}]   ;;  %s1248_s2 = inlined_call_operand.hbm [shape: f32[2,40], index: 2, kind: output, shape index: {}]  }
   0x1   :  { %8 = vsyncpa [#allocation6], 0 }
   0x2   :  { %9 = vsyncpa [#allocation4], 0  ;;  %s1056_s9 = smov [#allocation2]   ;;  %s1057_s11 = smov [#allocation5]  }
   0x3   :  { %s16_s10 = sshll.u32 %s1056_s9, 4  ;;  %s25_s12 = sshll.u32 %s1057_s11, 4  ;;  %s17_s10 = int_to_ptr.vmem [resolvable:$true] %s16_s10  ;;  %s26_s12 = int_to_ptr.vmem [resolvable:$true] %s25_s12 }
   0x4   :  { %s998_s13 = scalar_lea.vmem %s17_s10, 128  ;;  %p1003_p1 = scmp.lt.s32.totalorder %s17_s10, %s17_s10 }
   0x5   :  { %p999_p0 = scmp.ne.s32.totalorder %s17_s10, %s998_s13  ;;  %p1004_p2 = scmp.lt.s32.totalorder %s998_s13, %s998_s13 }
   0x7   :  { %p1005_p3 = por %p1004_p2, %p1003_p1 }
   0x9   :  { %p1006_p4 = pnand %p1005_p3, %p999_p0 }
   0xb   :  { %1009 = shalt.err (!%p1006_p4)
}
   0xc   :  { %19 = dma.hbm_to_vmem [thread:$0]  %s1246_s0, 128, %s17_s10, [#allocation3]  }
   0xd   :  { %s1018_s16 = scalar_lea.vmem %s26_s12, 512  ;;  %p1023_p6 = scmp.lt.s32.totalorder %s26_s12, %s26_s12 }
   0xe   :  { %p1019_p5 = scmp.ne.s32.totalorder %s26_s12, %s1018_s16  ;;  %p1024_p7 = scmp.lt.s32.totalorder %s1018_s16, %s1018_s16 }
  0x10   :  { %p1025_p8 = por %p1024_p7, %p1023_p6 }
  0x12   :  { %p1026_p9 = pnand %p1025_p8, %p1019_p5 }
  0x14   :  { %1029 = shalt.err (!%p1026_p9)
}
  0x15   :  { %s1058_s17 = smov 128   ;;  %s1059_s18 = smov 8  }
  0x16   :  { %31 = dma.hbm_to_vmem [thread:$0]  %s1247_s1, 512, %s26_s12, [#allocation6], %s1058_s17, %s1058_s17, %s1059_s18  }
  0x17   :  { %1050 = dma.done.wait [#allocation3], 128  }
  0x18   :  { %1051 = vsyncadd [#allocation3], 4294967168 }
  0x19   :  { %1052 = dma.done.wait [#allocation6], 512  }
  0x1a   :  { %1053 = vsyncadd [#allocation6], 4294966784  ;;  %v1060_v0 = vmov 0.0   ;;  %vm1061_vm0 = vmmov 0   ;;  %v1062_v1 = vmov 0   ;;  %v1099_v2 = vld [vmem:[#allocation5 + $0x18] sm:$0xff]  ;;  %v48_v10 = vlaneseq }
  0x1b   :  { %860 = vmatprep.subr.mxu0 %v1060_v0  ;;  %868 = vmatprep.mubr.msk.f32.mxu0 %vm1061_vm0, %v1060_v0  ;;  %v1101_v3 = vld [vmem:[#allocation5 + $0x10] sm:$0xff]  ;;  %v1104_v4 = vld [vmem:[#allocation2] sm:$0xff]  ;;  %v1108_v5 = vld [vmem:[#allocation5 + $0x8] sm:$0xff]  ;;  %vm101_vm1 = vcmask 261120   ;;  %v1063_v8 = vmov 1   ;;  %v1064_v9 = vmov 5  }
  0x1c   :  { %965 = vset.pattern.permute.xlu0 %v1062_v1  ;;  %871 = vmatprep.subr.mxu1 %v1060_v0  ;;  %v1114_v6 = vld [vmem:[#allocation5] sm:$0xff]  ;;  %v100_v7 = vrot.slane %v1104_v4, 4  ;;  %v49_v11 = vshrl.u32 %v48_v10, 7  ;;  %vm184_vm2 = vcmask 261126   ;;  %v1065_v29 = vmov 2   ;;  %s1070_s1 = smov [#allocation7]  }
  0x1d   :  { %879 = vmatprep.mubr.msk.f32.mxu1 %vm1061_vm0, %v1060_v0  ;;  %861 = vmatpush3.msra.mxu0 %v1099_v2  ;;  %v1066_v30 = vmov 7   ;;  %v1067_v31 = vmov 3   ;;  %v1068_v32 = vmov 4   ;;  %v1069_v33 = vmov 6   ;;  %s802_s21 = sshll.u32 %s1070_s1, 4  ;;  %s803_s21 = int_to_ptr.vmem [resolvable:$true] %s802_s21 }
  0x1e   :  { %872 = vmatpush3.msra.mxu1 %v1099_v2  ;;  %862 = vmatprep.subr.mxu0 %v1060_v0  ;;  %v50_v12 = vsub.s32 0, %v49_v11  ;;  %v55_v13 = vsub.s32 1, %v49_v11  ;;  %v181_v23 = vsub.s32 2, %v49_v11  ;;  %vm769_vm3 = vcmask 7168   ;;  %s1030_s22 = scalar_lea.vmem %s803_s21, 32  ;;  %p1035_p11 = scmp.lt.s32.totalorder %s803_s21, %s803_s21 }
  0x1f   :  { %45 = vperm.xlu0 %965, %v1104_v4   ;;  %863 = vmatpush3.msra.mxu0 %v1101_v3  ;;  %vm771_vm4 = vcmask 15360   ;;  %vm773_vm5 = vcmask 23552   ;;  %vm775_vm6 = vcmask 31744   ;;  %vm777_vm7 = vcmask 39936   ;;  %p1031_p10 = scmp.ne.s32.totalorder %s803_s21, %s1030_s22  ;;  %p1036_p12 = scmp.lt.s32.totalorder %s1030_s22, %s1030_s22 }
  0x20   :  { %873 = vmatprep.subr.mxu1 %v1060_v0  ;;  %864 = vmatprep.subr.mxu0 %v1060_v0  ;;  %v1141_v14 = vrot.slane %v1104_v4, %v50_v12  ;;  %v1145_v17 = vrot.slane %v1104_v4, %v55_v13  ;;  %v1149_v24 = vrot.slane %v1104_v4, %v181_v23  ;;  %vm779_vm8 = vcmask 48128  }
  0x21   :  { %874 = vmatpush3.msra.mxu1 %v1101_v3  ;;  %865 = vmatpush3.msra.mxu0 %v1108_v5  ;;  %vm781_vm9 = vcmask 56320   ;;  %vm792_vm10 = vcmask 64512   ;;  %vm794_vm11 = vcmask 326662   ;;  %p1037_p13 = por %p1036_p12, %p1035_p11 }
  0x22   :  { %875 = vmatprep.subr.mxu1 %v1060_v0  ;;  %866 = vmatprep.subr.mxu0 %v1060_v0 }
  0x23   :  { %966 = vset.pattern.permute.xlu0 %v1063_v8  ;;  %867 = vmatpush3.msra.mxu0 %v1114_v6  ;;  %p1038_p0 = pnand %p1037_p13, %p1031_p10 }
  0x24   :  { %59 = vperm.xlu0 %966, %v1104_v4   ;;  %869 = vmatmul.mubr.msk.f32.vlgmr.msra.gmra.mxu0 %vm101_vm1, %v100_v7 }
  0x25   :  { %876 = vmatpush3.msra.mxu1 %v1108_v5  ;;  %882 = vmatprep.subr.mxu0 %v1060_v0 }
  0x26   :  { %877 = vmatprep.subr.mxu1 %v1060_v0  ;;  %883 = vmatpush3.msra.mxu0 %v1099_v2 }
  0x27   :  { %878 = vmatpush3.msra.mxu1 %v1114_v6  ;;  %884 = vmatprep.subr.mxu0 %v1060_v0 }
  0x28   :  { %970 = vset.pattern.permute.xlu0 %v1064_v9  ;;  %885 = vmatpush3.msra.mxu0 %v1101_v3 }
  0x29   :  { %83 = vperm.xlu0 %970, %v1104_v4   ;;  %886 = vmatprep.subr.mxu0 %v1060_v0 }
  0x2a   :  { %890 = vmatprep.mubr.msk.f32.mxu0 %vm1061_vm0, %v1060_v0  ;;  %887 = vmatpush3.msra.mxu0 %v1108_v5 }
  0x2b   :  { %893 = vmatprep.subr.mxu1 %v1060_v0  ;;  %888 = vmatprep.subr.mxu0 %v1060_v0 }
  0x2c   :  { %889 = vmatpush3.msra.mxu0 %v1114_v6  ;;  %967 = vset.pattern.permute.xlu1 %v1065_v29 }
  0x2d   :  { %904 = vmatprep.subr.mxu0 %v1060_v0  ;;  %65 = vperm.xlu1 %967, %v1104_v4  }
  0x2e   :  { %973 = vset.pattern.permute.xlu0 %v1066_v30 }
  0x31   :  { %968 = vset.pattern.permute.xlu1 %v1067_v31 }
  0x32   :  { %71 = vperm.xlu1 %968, %v1104_v4  }
  0x36   :  { %969 = vset.pattern.permute.xlu1 %v1068_v32 }
  0x37   :  { %77 = vperm.xlu1 %969, %v1104_v4  }
  0x3b   :  { %971 = vset.pattern.permute.xlu1 %v1069_v33 }
  0x3c   :  { %89 = vperm.xlu1 %971, %v1104_v4  }
  0x40   :  { %972 = vset.pattern.permute.xlu1 %v1066_v30 }
  0x41   :  { %95 = vperm.xlu1 %972, %v1104_v4  }
  0x9a   :  { %v46_v15 = vpop.permute.xlu0 %45 }
  0x9b   :  { %v52_v16 = vmul.f32 %v1141_v14, %v46_v15 }
  0x9d   :  { %v57_v18 = vadd.f32 %v1145_v17, %v52_v16 }
  0x9f   :  { %v60_v34 = vpop.permute.xlu0 %59 }
  0xa0   :  { %v62_v35 = vmul.f32 %v60_v34, %v1141_v14 }
  0xa2   :  { %v63_v36 = vadd.f32 %v62_v35, %v1145_v17 }
  0xa8   :  { %v66_v45 = vpop.permute.xlu1 %65 }
  0xa9   :  { %v68_v46 = vmul.f32 %v66_v45, %v1141_v14 }
  0xab   :  { %v69_v47 = vadd.f32 %v68_v46, %v1145_v17 }
  0xad   :  { %v72_v56 = vpop.permute.xlu1 %71 }
  0xae   :  { %v74_v57 = vmul.f32 %v72_v56, %v1141_v14 }
  0xb0   :  { %v75_v58 = vadd.f32 %v74_v57, %v1145_v17 }
  0xb2   :  { %v78_v9 = vpop.permute.xlu1 %77 }
  0xb3   :  { %v80_v10 = vmul.f32 %v78_v9, %v1141_v14 }
  0xb5   :  { %v81_v11 = vadd.f32 %v80_v10, %v1145_v17 }
  0xe4   :  { %v170_v19 = vpop.f32.mrf.mxu0 }
  0xe5   :  { %v175_v20 = vrot.slane %v170_v19, 2 }
  0xe6   :  { %v870_v21 = vpop.f32.mrf.mxu0 }
  0xe7   :  { %v177_v22 = vadd.f32 %v175_v20, %v57_v18 }
  0xe9   :  { %974 = vtanh.f32 %v177_v22  ;;  %v84_v22 = vpop.permute.xlu0 %83 }
  0xea   :  { %v86_v23 = vmul.f32 %v84_v22, %v1141_v14 }
  0xf6   :  { %v975_v25 = vpop.eup %974 }
  0xf7   :  { %v189_v26 = vrot.slane %v975_v25, 6  ;;  %v183_v27 = vmul.f32 %v975_v25, %v1149_v24 }
  0xf9   :  { %880 = vmatmul.mubr.msk.f32.vlgmr.msra.gmra.mxu1 %vm101_vm1, %v189_v26  ;;  %v185_v28 = vsel %vm184_vm2, %v183_v27, 0.0 }
  0xfa   :  { %186 = vadd.xlane.f32.xlu0 %v185_v28  ;;  %894 = vmatpush3.msra.mxu1 %v1099_v2 }
  0xfb   :  { %895 = vmatprep.subr.mxu1 %v1060_v0  ;;  %901 = vmatprep.mubr.msk.f32.mxu1 %vm1061_vm0, %v1060_v0 }
  0xfc   :  { %896 = vmatpush3.msra.mxu1 %v1101_v3 }
  0xfd   :  { %897 = vmatprep.subr.mxu1 %v1060_v0 }
  0xfe   :  { %898 = vmatpush3.msra.mxu1 %v1108_v5 }
  0xff   :  { %899 = vmatprep.subr.mxu1 %v1060_v0 }
 0x100   :  { %900 = vmatpush3.msra.mxu1 %v1114_v6 }
 0x101   :  { %915 = vmatprep.subr.mxu1 %v1060_v0 }
 0x1b9   :  { %v258_v37 = vpop.f32.mrf.mxu1 }
 0x1ba   :  { %v263_v38 = vrot.slane %v258_v37, 2 }
 0x1bb   :  { %v881_v39 = vpop.f32.mrf.mxu1 }
 0x1bc   :  { %v265_v40 = vadd.f32 %v263_v38, %v63_v36 }
 0x1be   :  { %976 = vtanh.f32 %v265_v40  ;;  %v783_v40 = vrot.slane %v1104_v4, 3  ;;  %v187_v4 = vpop.xlane.xlu0 %186 }
 0x1c0   :  { %948 = vpush %v783_v40 }
 0x1cb   :  { %v977_v41 = vpop.eup %976 }
 0x1cc   :  { %v272_v42 = vrot.slane %v977_v41, 6  ;;  %v267_v43 = vmul.f32 %v977_v41, %v1149_v24 }
 0x1ce   :  { %891 = vmatmul.mubr.msk.f32.vlgmr.msra.gmra.mxu0 %vm101_vm1, %v272_v42  ;;  %v268_v44 = vsel %vm184_vm2, %v267_v43, 0.0 }
 0x1cf   :  { %269 = vadd.xlane.f32.xlu1 %v268_v44  ;;  %905 = vmatpush3.msra.mxu0 %v1099_v2 }
 0x1d0   :  { %906 = vmatprep.subr.mxu0 %v1060_v0  ;;  %912 = vmatprep.mubr.msk.f32.mxu0 %vm1061_vm0, %v1060_v0 }
 0x1d1   :  { %907 = vmatpush3.msra.mxu0 %v1101_v3 }
 0x1d2   :  { %908 = vmatprep.subr.mxu0 %v1060_v0 }
 0x1d3   :  { %909 = vmatpush3.msra.mxu0 %v1108_v5 }
 0x1d4   :  { %910 = vmatprep.subr.mxu0 %v1060_v0 }
 0x1d5   :  { %911 = vmatpush3.msra.mxu0 %v1114_v6 }
 0x1d6   :  { %926 = vmatprep.subr.mxu0 %v1060_v0 }
 0x1f1   :  { %s949_s0 = spop %948 }
 0x28e   :  { %v341_v48 = vpop.f32.mrf.mxu0 }
 0x28f   :  { %v346_v49 = vrot.slane %v341_v48, 2 }
 0x290   :  { %v892_v50 = vpop.f32.mrf.mxu0 }
 0x291   :  { %v348_v51 = vadd.f32 %v346_v49, %v69_v47 }
 0x293   :  { %978 = vtanh.f32 %v348_v51 }
 0x2a0   :  { %v979_v52 = vpop.eup %978 }
 0x2a1   :  { %v355_v53 = vrot.slane %v979_v52, 6  ;;  %v350_v54 = vmul.f32 %v979_v52, %v1149_v24 }
 0x2a3   :  { %902 = vmatmul.mubr.msk.f32.vlgmr.msra.gmra.mxu1 %vm101_vm1, %v355_v53  ;;  %v351_v55 = vsel %vm184_vm2, %v350_v54, 0.0 }
 0x2a4   :  { %352 = vadd.xlane.f32.xlu0 %v351_v55  ;;  %916 = vmatpush3.msra.mxu1 %v1099_v2 }
 0x2a5   :  { %917 = vmatprep.subr.mxu1 %v1060_v0  ;;  %923 = vmatprep.mubr.msk.f32.mxu1 %vm1061_vm0, %v1060_v0 }
 0x2a6   :  { %918 = vmatpush3.msra.mxu1 %v1101_v3 }
 0x2a7   :  { %919 = vmatprep.subr.mxu1 %v1060_v0 }
 0x2a8   :  { %920 = vmatpush3.msra.mxu1 %v1108_v5 }
 0x2a9   :  { %921 = vmatprep.subr.mxu1 %v1060_v0 }
 0x2aa   :  { %922 = vmatpush3.msra.mxu1 %v1114_v6 }
 0x2ab   :  { %937 = vmatprep.subr.mxu1 %v1060_v0 }
 0x32d   :  { %v353_v51 = vpop.xlane.xlu0 %352 }
 0x363   :  { %v424_v59 = vpop.f32.mrf.mxu1 }
 0x364   :  { %v429_v60 = vrot.slane %v424_v59, 2  ;;  %v785_v59 = vstv %s949_s0 }
 0x365   :  { %v903_v61 = vpop.f32.mrf.mxu1 }
 0x366   :  { %v431_v62 = vadd.f32 %v429_v60, %v75_v58 }
 0x368   :  { %980 = vtanh.f32 %v431_v62 }
 0x375   :  { %v981_v63 = vpop.eup %980 }
 0x376   :  { %v438_v1 = vrot.slane %v981_v63, 6  ;;  %v433_v7 = vmul.f32 %v981_v63, %v1149_v24 }
 0x378   :  { %913 = vmatmul.mubr.msk.f32.vlgmr.msra.gmra.mxu0 %vm101_vm1, %v438_v1  ;;  %v434_v8 = vsel %vm184_vm2, %v433_v7, 0.0 }
 0x379   :  { %435 = vadd.xlane.f32.xlu0 %v434_v8  ;;  %927 = vmatpush3.msra.mxu0 %v1099_v2 }
 0x37a   :  { %928 = vmatprep.subr.mxu0 %v1060_v0  ;;  %934 = vmatprep.mubr.msk.f32.mxu0 %vm1061_vm0, %v1060_v0 }
 0x37b   :  { %929 = vmatpush3.msra.mxu0 %v1101_v3 }
 0x37c   :  { %930 = vmatprep.subr.mxu0 %v1060_v0 }
 0x37d   :  { %931 = vmatpush3.msra.mxu0 %v1108_v5 }
 0x37e   :  { %932 = vmatprep.subr.mxu0 %v1060_v0 }
 0x37f   :  { %933 = vmatpush3.msra.mxu0 %v1114_v6 }
 0x438   :  { %v507_v12 = vpop.f32.mrf.mxu0 }
 0x439   :  { %v512_v13 = vrot.slane %v507_v12, 2 }
 0x43a   :  { %v914_v15 = vpop.f32.mrf.mxu0 }
 0x43b   :  { %v514_v16 = vadd.f32 %v512_v13, %v81_v11 }
 0x43d   :  { %982 = vtanh.f32 %v514_v16 }
 0x44a   :  { %v983_v18 = vpop.eup %982 }
 0x44b   :  { %v521_v19 = vrot.slane %v983_v18, 6  ;;  %v516_v20 = vmul.f32 %v983_v18, %v1149_v24 }
 0x44d   :  { %924 = vmatmul.mubr.msk.f32.vlgmr.msra.gmra.mxu1 %vm101_vm1, %v521_v19  ;;  %v517_v21 = vsel %vm184_vm2, %v516_v20, 0.0 }
 0x44e   :  { %518 = vadd.xlane.f32.xlu1 %v517_v21  ;;  %938 = vmatpush3.msra.mxu1 %v1099_v2  ;;  %v87_v2 = vadd.f32 %v86_v23, %v1145_v17 }
 0x44f   :  { %939 = vmatprep.subr.mxu1 %v1060_v0  ;;  %945 = vmatprep.mubr.msk.f32.mxu1 %vm1061_vm0, %v1060_v0 }
 0x450   :  { %940 = vmatpush3.msra.mxu1 %v1101_v3 }
 0x451   :  { %941 = vmatprep.subr.mxu1 %v1060_v0 }
 0x452   :  { %942 = vmatpush3.msra.mxu1 %v1108_v5  ;;  %v90_v5 = vpop.permute.xlu1 %89 }
 0x453   :  { %943 = vmatprep.subr.mxu1 %v1060_v0 }
 0x454   :  { %944 = vmatpush3.msra.mxu1 %v1114_v6  ;;  %v92_v6 = vmul.f32 %v90_v5, %v1141_v14 }
 0x456   :  { %v93_v31 = vadd.f32 %v92_v6, %v1145_v17  ;;  %v96_v41 = vpop.permute.xlu1 %95 }
 0x457   :  { %v98_v42 = vmul.f32 %v96_v41, %v1141_v14  ;;  %v436_v14 = vpop.xlane.xlu0 %435 }
 0x459   :  { %v99_v43 = vadd.f32 %v98_v42, %v1145_v17 }
 0x45a   :  { %v270_v52 = vpop.xlane.xlu1 %269 }
 0x45b   :  { %v770_v53 = vsel %vm769_vm3, %v187_v4, %v270_v52 }
 0x45c   :  { %v772_v54 = vsel %vm771_vm4, %v770_v53, %v353_v51 }
 0x45d   :  { %v774_v56 = vsel %vm773_vm5, %v772_v54, %v436_v14 }
 0x4d7   :  { %v519_v17 = vpop.xlane.xlu1 %518 }
 0x4d8   :  { %v776_v57 = vsel %vm775_vm6, %v774_v56, %v519_v17 }
 0x50d   :  { %v590_v25 = vpop.f32.mrf.mxu1 }
 0x50e   :  { %v595_v26 = vrot.slane %v590_v25, 2 }
 0x50f   :  { %v925_v27 = vpop.f32.mrf.mxu1 }
 0x510   :  { %v597_v28 = vadd.f32 %v595_v26, %v87_v2 }
 0x512   :  { %984 = vtanh.f32 %v597_v28 }
 0x51f   :  { %v985_v29 = vpop.eup %984 }
 0x520   :  { %v604_v3 = vrot.slane %v985_v29, 6  ;;  %v599_v30 = vmul.f32 %v985_v29, %v1149_v24 }
 0x522   :  { %935 = vmatmul.mubr.msk.f32.vlgmr.msra.gmra.mxu0 %vm101_vm1, %v604_v3  ;;  %v600_v0 = vsel %vm184_vm2, %v599_v30, 0.0 }
 0x523   :  { %601 = vadd.xlane.f32.xlu0 %v600_v0 }
 0x5ac   :  { %v602_v55 = vpop.xlane.xlu0 %601 }
 0x5ad   :  { %v778_v58 = vsel %vm777_vm7, %v776_v57, %v602_v55 }
 0x5e2   :  { %v673_v32 = vpop.f32.mrf.mxu0 }
 0x5e3   :  { %v678_v33 = vrot.slane %v673_v32, 2 }
 0x5e4   :  { %v936_v34 = vpop.f32.mrf.mxu0 }
 0x5e5   :  { %v680_v35 = vadd.f32 %v678_v33, %v93_v31 }
 0x5e7   :  { %986 = vtanh.f32 %v680_v35 }
 0x5f4   :  { %v987_v36 = vpop.eup %986 }
 0x5f5   :  { %v687_v37 = vrot.slane %v987_v36, 6  ;;  %v682_v38 = vmul.f32 %v987_v36, %v1149_v24 }
 0x5f7   :  { %946 = vmatmul.mubr.msk.f32.vlgmr.msra.gmra.mxu1 %vm101_vm1, %v687_v37  ;;  %v683_v39 = vsel %vm184_vm2, %v682_v38, 0.0 }
 0x5f8   :  { %684 = vadd.xlane.f32.xlu1 %v683_v39 }
 0x6b7   :  { %v756_v44 = vpop.f32.mrf.mxu1 }
 0x6b8   :  { %v761_v45 = vrot.slane %v756_v44, 2 }
 0x6b9   :  { %v947_v46 = vpop.f32.mrf.mxu1 }
 0x6ba   :  { %v763_v47 = vadd.f32 %v761_v45, %v99_v43 }
 0x6bc   :  { %988 = vtanh.f32 %v763_v47 }
 0x6c9   :  { %v989_v48 = vpop.eup %988 }
 0x6ca   :  { %789 = vrot.lane.b32.xlu1 %v989_v48, %s1059_s18  ;;  %v765_v49 = vmul.f32 %v989_v48, %v1149_v24  ;;  %v685_v24 = vpop.xlane.xlu1 %684 }
 0x6cb   :  { %v780_v60 = vsel %vm779_vm8, %v778_v58, %v685_v24 }
 0x6cc   :  { %v766_v50 = vsel %vm184_vm2, %v765_v49, 0.0 }
 0x6cd   :  { %767 = vadd.xlane.f32.xlu0 %v766_v50 }
 0x73c   :  { %v790_v1 = vpop.permute.xlu1 %789 }
 0x756   :  { %v768_v61 = vpop.xlane.xlu0 %767 }
 0x757   :  { %v782_v62 = vsel %vm781_vm9, %v780_v60, %v768_v61 }
 0x758   :  { %v787_v63 = vadd.f32 %v785_v59, %v782_v62 }
 0x75a   :  { %v793_v7 = vsel %vm792_vm10, %v787_v63, %v790_v1 }
 0x75b   :  { %795 = vst.msk [vmem:[#allocation7 - $0x6] sm:$0xc0] %vm794_vm11, %v793_v7 }
 0x75c   :  { %1041 = shalt.err (!%p1038_p0)
}
 0x75d   :  { %805 = dma.vmem_to_hbm [thread:$0]  %s803_s21, 32, %s1248_s2, [#allocation4]  }
 0x75e   :  { %1054 = dma.done.wait [#allocation4], 32  }
 0x75f   :  { %1055 = vsyncadd [#allocation4], 4294967264 }
 0x760   :  { %809 = vsyncpa [#allocation3], 1 }
 0x761   :  { %810 = vsyncpa [#allocation6], 1 }
 0x762   :  { %811 = vsyncpa [#allocation4], 1 }

</bundles_post_ra>
